<compile_context>
chip_gen: v5e
topology: v5e:2x2
jax: 0.10.0
libtpu: 0.0.40
codegen_flags: <defaults>
</compile_context>

<pallas_src>
import functools

import jax
import jax.numpy as jnp
from jax import lax
from jax.experimental import pallas as pl
from jax.experimental.pallas import tpu as pltpu


def _round_up(x, m):
    return ((x + m - 1) // m) * m


def prob_mlp_kernel(x_ref, w1_ref, b1_ref, w2_ref, b2_ref, wh_ref, bh_ref, o_ref):
    # Contract activation feature dim against the weight's "in" dim (native
    # PyTorch (out, in) layout) -> no transposed weight copies needed.
    contract = (((1,), (1,)), ((), ()))

    # Hidden layer 1: (TB, S) x (H1, S)^T -> (TB, H1)
    h = lax.dot_general(x_ref[...], w1_ref[...], contract,
                        preferred_element_type=jnp.float32)
    h = jnp.maximum(h + b1_ref[...], 0.0)

    # Hidden layer 2: (TB, H1) x (H2, H1)^T -> (TB, H2)
    h = lax.dot_general(h, w2_ref[...], contract,
                        preferred_element_type=jnp.float32)
    h = jnp.maximum(h + b2_ref[...], 0.0)

    # Fused heads: (TB, H2) x (2*A, H2)^T -> (TB, 2*A)  [mean | log_var]
    y = lax.dot_general(h, wh_ref[...], contract,
                        preferred_element_type=jnp.float32)
    o_ref[...] = (y + bh_ref[...]).astype(o_ref.dtype)


@functools.partial(jax.jit, static_argnames=("batch_tile",))
def prob_nn_forward(x, w1, b1, w2, b2, w_mean, b_mean, w_log_var, b_log_var,
                    *, batch_tile=256):
    """Forward pass. Weights are in PyTorch nn.Linear layout: W is (out, in), b is (out,).

    Returns (mean, log_var), each (B, action_dim), float32.
    """
    B, state_dim = x.shape
    h1 = w1.shape[0]
    h2 = w2.shape[0]
    action_dim = w_mean.shape[0]
    out_w = 2 * action_dim

    # Fuse the two heads into one weight/bias so the head matmul + output store
    # happen once per tile.
    w_heads = jnp.concatenate([w_mean, w_log_var], axis=0)          # (2A, H2)
    b_heads = jnp.concatenate([b_mean, b_log_var], axis=0)[None, :]  # (1, 2A)
    b1_2d = b1[None, :]                                              # (1, H1)
    b2_2d = b2[None, :]                                              # (1, H2)

    # Batch tiling: TB is a multiple of 8 (sublane); pad B so the grid is exact.
    tb = min(batch_tile, _round_up(B, 8))
    b_pad = _round_up(B, tb)
    if b_pad != B:
        x = jnp.pad(x, ((0, b_pad - B), (0, 0)))
    grid = (b_pad // tb,)

    resident = lambda shape: pl.BlockSpec(shape, lambda i: (0, 0))

    flops = 2 * B * (state_dim * h1 + h1 * h2 + h2 * out_w)
    bytes_accessed = 4 * (B * state_dim + h1 * state_dim + h1
                          + h2 * h1 + h2 + out_w * h2 + out_w + B * out_w)

    out = pl.pallas_call(
        prob_mlp_kernel,
        out_shape=jax.ShapeDtypeStruct((b_pad, out_w), jnp.float32),
        grid=grid,
        in_specs=[
            pl.BlockSpec((tb, state_dim), lambda i: (i, 0)),   # x: streamed per tile
            resident((h1, state_dim)),                         # w1 (resident)
            resident((1, h1)),                                 # b1
            resident((h2, h1)),                                # w2
            resident((1, h2)),                                 # b2
            resident((out_w, h2)),                             # fused head weights
            resident((1, out_w)),                              # fused head bias
        ],
        out_specs=pl.BlockSpec((tb, out_w), lambda i: (i, 0)),
        compiler_params=pltpu.CompilerParams(
            dimension_semantics=("parallel",),        # megacore split on v7x
            vmem_limit_bytes=32 * 1024 * 1024,        # explicit; safe on 64 MiB v7x
        ),
        cost_estimate=pl.CostEstimate(
            flops=flops, transcendentals=0, bytes_accessed=bytes_accessed),
    )(x, w1, b1_2d, w2, b2_2d, w_heads, b_heads)

    out = out[:B]
    return out[:, :action_dim], out[:, action_dim:]


def reference_forward(x, w1, b1, w2, b2, w_mean, b_mean, w_log_var, b_log_var):
    h = jnp.maximum(x @ w1.T + b1, 0.0)
    h = jnp.maximum(h @ w2.T + b2, 0.0)
    return h @ w_mean.T + b_mean, h @ w_log_var.T + b_log_var


if __name__ == "__main__":
    # Shapes consistent with the module defaults: state_dim=8, hidden=[64, 64], action_dim=2
    batch, state_dim, h1, h2, action_dim = 8, 8, 64, 64, 2

    key = jax.random.PRNGKey(0)
    ks = jax.random.split(key, 9)

    x = jax.random.normal(ks[0], (batch, state_dim), dtype=jnp.float32)
    # PyTorch Linear layout: weight (out, in), bias (out,)
    w1 = jax.random.normal(ks[1], (h1, state_dim), dtype=jnp.float32) * 0.1
    b1 = jax.random.normal(ks[2], (h1,), dtype=jnp.float32) * 0.1
    w2 = jax.random.normal(ks[3], (h2, h1), dtype=jnp.float32) * 0.1
    b2 = jax.random.normal(ks[4], (h2,), dtype=jnp.float32) * 0.1
    w_mean = jax.random.normal(ks[5], (action_dim, h2), dtype=jnp.float32) * 0.1
    b_mean = jax.random.normal(ks[6], (action_dim,), dtype=jnp.float32) * 0.1
    w_log_var = jax.random.normal(ks[7], (action_dim, h2), dtype=jnp.float32) * 0.1
    b_log_var = jax.random.normal(ks[8], (action_dim,), dtype=jnp.float32) * 0.1

    mean, log_var = prob_nn_forward(
        x, w1, b1, w2, b2, w_mean, b_mean, w_log_var, b_log_var)
    mean = jax.block_until_ready(mean)
    log_var = jax.block_until_ready(log_var)

    ref_mean, ref_log_var = reference_forward(
        x, w1, b1, w2, b2, w_mean, b_mean, w_log_var, b_log_var)

    assert mean.shape == (batch, action_dim)
    assert log_var.shape == (batch, action_dim)
    assert jnp.allclose(mean, ref_mean, atol=1e-4, rtol=1e-4), "mean mismatch vs reference"
    assert jnp.allclose(log_var, ref_log_var, atol=1e-4, rtol=1e-4), "log_var mismatch vs reference"

    print("KERNEL_OK")
</pallas_src>

<mosaic_0001>
module attributes {stable_mosaic.version = 11 : i64} {
  func.func @prob_mlp_kernel(%arg0: i32, %arg1: memref<8x8xf32, #tpu.memory_space<vmem>>, %arg2: memref<64x8xf32, #tpu.memory_space<vmem>>, %arg3: memref<1x64xf32, #tpu.memory_space<vmem>>, %arg4: memref<64x64xf32, #tpu.memory_space<vmem>>, %arg5: memref<1x64xf32, #tpu.memory_space<vmem>>, %arg6: memref<4x64xf32, #tpu.memory_space<vmem>>, %arg7: memref<1x4xf32, #tpu.memory_space<vmem>>, %arg8: memref<8x4xf32, #tpu.memory_space<vmem>>) attributes {dimension_semantics = [#tpu.dimension_semantics<parallel>], iteration_bounds = array<i64: 1>, scalar_prefetch = 0 : i64, scratch_operands = 0 : i64, tpu.core_type = #tpu.core_type<tc>, window_params = [{transform_indices = @transform_0, window_bounds = array<i64: 8, 8>}, {pipeline_mode = #tpu.pipeline_mode<synchronous>, transform_indices = @transform_1, window_bounds = array<i64: 64, 8>}, {pipeline_mode = #tpu.pipeline_mode<synchronous>, transform_indices = @transform_2, window_bounds = array<i64: 1, 64>}, {pipeline_mode = #tpu.pipeline_mode<synchronous>, transform_indices = @transform_3, window_bounds = array<i64: 64, 64>}, {pipeline_mode = #tpu.pipeline_mode<synchronous>, transform_indices = @transform_4, window_bounds = array<i64: 1, 64>}, {pipeline_mode = #tpu.pipeline_mode<synchronous>, transform_indices = @transform_5, window_bounds = array<i64: 4, 64>}, {pipeline_mode = #tpu.pipeline_mode<synchronous>, transform_indices = @transform_6, window_bounds = array<i64: 1, 4>}, {transform_indices = @transform_7, window_bounds = array<i64: 8, 4>}]} {
    %c0 = arith.constant 0 : index
    %c0_0 = arith.constant 0 : index
    %0 = vector.load %arg1[%c0, %c0_0] : memref<8x8xf32, #tpu.memory_space<vmem>>, vector<8x8xf32>
    %c0_1 = arith.constant 0 : index
    %c0_2 = arith.constant 0 : index
    %1 = vector.load %arg2[%c0_1, %c0_2] : memref<64x8xf32, #tpu.memory_space<vmem>>, vector<64x8xf32>
    %cst = arith.constant dense<0.000000e+00> : vector<8x64xf32>
    %2 = tpu.matmul %0, %1, %cst {dimension_numbers = #tpu.dot_dimension_numbers<[1], [1], [0], [0], [0, 0, 1, 0], [], []>} : vector<8x8xf32>, vector<64x8xf32>, vector<8x64xf32> -> vector<8x64xf32>
    %c0_3 = arith.constant 0 : index
    %c0_4 = arith.constant 0 : index
    %3 = vector.load %arg3[%c0_3, %c0_4] : memref<1x64xf32, #tpu.memory_space<vmem>>, vector<1x64xf32>
    %4 = vector.broadcast %3 : vector<1x64xf32> to vector<8x64xf32>
    %5 = arith.addf %2, %4 : vector<8x64xf32>
    %cst_5 = arith.constant 0.000000e+00 : f32
    %6 = vector.broadcast %cst_5 : f32 to vector<8x64xf32>
    %7 = arith.maximumf %5, %6 : vector<8x64xf32>
    %c0_6 = arith.constant 0 : index
    %c0_7 = arith.constant 0 : index
    %8 = vector.load %arg4[%c0_6, %c0_7] : memref<64x64xf32, #tpu.memory_space<vmem>>, vector<64x64xf32>
    %cst_8 = arith.constant dense<0.000000e+00> : vector<8x64xf32>
    %9 = tpu.matmul %7, %8, %cst_8 {dimension_numbers = #tpu.dot_dimension_numbers<[1], [1], [0], [0], [0, 0, 1, 0], [], []>} : vector<8x64xf32>, vector<64x64xf32>, vector<8x64xf32> -> vector<8x64xf32>
    %c0_9 = arith.constant 0 : index
    %c0_10 = arith.constant 0 : index
    %10 = vector.load %arg5[%c0_9, %c0_10] : memref<1x64xf32, #tpu.memory_space<vmem>>, vector<1x64xf32>
    %11 = vector.broadcast %10 : vector<1x64xf32> to vector<8x64xf32>
    %12 = arith.addf %9, %11 : vector<8x64xf32>
    %cst_11 = arith.constant 0.000000e+00 : f32
    %13 = vector.broadcast %cst_11 : f32 to vector<8x64xf32>
    %14 = arith.maximumf %12, %13 : vector<8x64xf32>
    %c0_12 = arith.constant 0 : index
    %c0_13 = arith.constant 0 : index
    %15 = vector.load %arg6[%c0_12, %c0_13] : memref<4x64xf32, #tpu.memory_space<vmem>>, vector<4x64xf32>
    %cst_14 = arith.constant dense<0.000000e+00> : vector<8x4xf32>
    %16 = tpu.matmul %14, %15, %cst_14 {dimension_numbers = #tpu.dot_dimension_numbers<[1], [1], [0], [0], [0, 0, 1, 0], [], []>} : vector<8x64xf32>, vector<4x64xf32>, vector<8x4xf32> -> vector<8x4xf32>
    %c0_15 = arith.constant 0 : index
    %c0_16 = arith.constant 0 : index
    %17 = vector.load %arg7[%c0_15, %c0_16] : memref<1x4xf32, #tpu.memory_space<vmem>>, vector<1x4xf32>
    %18 = vector.broadcast %17 : vector<1x4xf32> to vector<8x4xf32>
    %19 = arith.addf %16, %18 : vector<8x4xf32>
    %c0_17 = arith.constant 0 : index
    %c0_18 = arith.constant 0 : index
    %20 = vector.load %arg8[%c0_17, %c0_18] : memref<8x4xf32, #tpu.memory_space<vmem>>, vector<8x4xf32>
    tpu.vector_store %arg8[%c0_17, %c0_18], %19 {strides = array<i32>} : memref<8x4xf32, #tpu.memory_space<vmem>>, vector<8x4xf32>,
    return
  }
  func.func @transform_0(%arg0: i32) -> (i32, i32) {
    %c0_i32 = arith.constant 0 : i32
    %c0_i32_0 = arith.constant 0 : i32
    return %arg0, %c0_i32 : i32, i32
  }
  func.func @transform_1(%arg0: i32) -> (i32, i32) {
    %c0_i32 = arith.constant 0 : i32
    %c0_i32_0 = arith.constant 0 : i32
    %c0_i32_1 = arith.constant 0 : i32
    return %c0_i32, %c0_i32_0 : i32, i32
  }
  func.func @transform_2(%arg0: i32) -> (i32, i32) {
    %c0_i32 = arith.constant 0 : i32
    %c0_i32_0 = arith.constant 0 : i32
    %c0_i32_1 = arith.constant 0 : i32
    return %c0_i32, %c0_i32_0 : i32, i32
  }
  func.func @transform_3(%arg0: i32) -> (i32, i32) {
    %c0_i32 = arith.constant 0 : i32
    %c0_i32_0 = arith.constant 0 : i32
    %c0_i32_1 = arith.constant 0 : i32
    return %c0_i32, %c0_i32_0 : i32, i32
  }
  func.func @transform_4(%arg0: i32) -> (i32, i32) {
    %c0_i32 = arith.constant 0 : i32
    %c0_i32_0 = arith.constant 0 : i32
    %c0_i32_1 = arith.constant 0 : i32
    return %c0_i32, %c0_i32_0 : i32, i32
  }
  func.func @transform_5(%arg0: i32) -> (i32, i32) {
    %c0_i32 = arith.constant 0 : i32
    %c0_i32_0 = arith.constant 0 : i32
    %c0_i32_1 = arith.constant 0 : i32
    return %c0_i32, %c0_i32_0 : i32, i32
  }
  func.func @transform_6(%arg0: i32) -> (i32, i32) {
    %c0_i32 = arith.constant 0 : i32
    %c0_i32_0 = arith.constant 0 : i32
    %c0_i32_1 = arith.constant 0 : i32
    return %c0_i32, %c0_i32_0 : i32, i32
  }
  func.func @transform_7(%arg0: i32) -> (i32, i32) {
    %c0_i32 = arith.constant 0 : i32
    %c0_i32_0 = arith.constant 0 : i32
    return %arg0, %c0_i32 : i32, i32
  }
}

</mosaic_0001>

<bundles_post_ra>
// kernel: prob_nn_forward.1
= control target key start
LH: loop header
LB: loop body
LE: loop exit
PB: predicated region body
PF: predicated region fallthrough
CT: control target
= control target key end

     0   :  { %vm39_vm0 = vcmask 64512   ;;  %vm100_vm1 = vcmask 523264   ;;  %vm180_vm2 = vcmask 31744   ;;  %s335_s1 = inlined_call_operand.vmem [shape: f32[64,8], index: 1, kind: input, shape index: {}]   ;;  %s336_s3 = inlined_call_operand.vmem [shape: f32[64,64], index: 3, kind: input, shape index: {}]   ;;  %s337_s2 = inlined_call_operand.vmem [shape: f32[1,64], index: 2, kind: input, shape index: {}]   ;;  %s338_s0 = inlined_call_operand.vmem [shape: f32[8,8], index: 0, kind: input, shape index: {}]   ;;  %s339_s4 = inlined_call_operand.vmem [shape: f32[1,64], index: 4, kind: input, shape index: {}]   ;;  %s340_s6 = inlined_call_operand.vmem [shape: f32[1,4], index: 6, kind: input, shape index: {}]   ;;  %s341_s5 = inlined_call_operand.vmem [shape: f32[4,64], index: 5, kind: input, shape index: {}]   ;;  %s342_s7 = inlined_call_operand.vmem [shape: f32[8,4], index: 7, kind: output, shape index: {}]  }
   0x1   :  { %v34_v0 = vld [vmem:[%s335_s1 + $0x38] sm:$0xff]  ;;  %v33_v1 = vld [vmem:[%s335_s1 + $0x30] sm:$0xff]  ;;  %v32_v4 = vld [vmem:[%s335_s1 + $0x28] sm:$0xff] }
   0x2   :  { %186 = vmatpush.xpose.msk.msra.mxu0 %vm39_vm0, %v34_v0  ;;  %v95_v2 = vld [vmem:[%s336_s3 + $0x38] sm:$0xff]  ;;  %v94_v3 = vld [vmem:[%s336_s3 + $0x30] sm:$0xff]  ;;  %v93_v5 = vld [vmem:[%s336_s3 + $0x28] sm:$0xff] }
   0x3   :  { %195 = vmatpush.xpose.msk.msra.mxu1 %vm100_vm1, %v95_v2  ;;  %v31_v6 = vld [vmem:[%s335_s1 + $0x20] sm:$0xff]  ;;  %v30_v8 = vld [vmem:[%s335_s1 + $0x18] sm:$0xff]  ;;  %v29_v10 = vld [vmem:[%s335_s1 + $0x10] sm:$0xff] }
   0x4   :  { %v92_v7 = vld [vmem:[%s336_s3 + $0x20] sm:$0xff]  ;;  %v91_v9 = vld [vmem:[%s336_s3 + $0x18] sm:$0xff]  ;;  %v90_v11 = vld [vmem:[%s336_s3 + $0x10] sm:$0xff] }
   0x5   :  { %v28_v12 = vld [vmem:[%s335_s1 + $0x8] sm:$0xff]  ;;  %v27_v14 = vld [vmem:[%s335_s1] sm:$0xff] }
   0x6   :  { %187 = vmatpush.xpose.msk.msra.mxu0 %vm39_vm0, %v33_v1  ;;  %v89_v13 = vld [vmem:[%s336_s3 + $0x8] sm:$0xff]  ;;  %v26_v15 = vld [vmem:[%s338_s0] sm:$0xff] }
   0x7   :  { %196 = vmatpush.xpose.msk.msra.mxu1 %vm100_vm1, %v94_v3  ;;  %v88_v16 = vld [vmem:[%s336_s3] sm:$0xff] }
   0x8   :  { %v206_v17 = vld [vmem:[%s337_s2] ss:$0 sm:$0xff] }
   0x9   :  { %v149_v21 = vld [vmem:[%s341_s5] sm:$0xf] }
   0xa   :  { %188 = vmatpush.xpose.msk.msra.mxu0 %vm39_vm0, %v32_v4  ;;  %204 = vmatpush.xpose.msk.msra.mxu2 %vm100_vm1, %v149_v21  ;;  %v207_v22 = vld [vmem:[%s339_s4] ss:$0 sm:$0xff] }
   0xb   :  { %197 = vmatpush.xpose.msk.msra.mxu1 %vm100_vm1, %v93_v5  ;;  %v208_v26 = vld [vmem:[%s340_s6] ss:$0 sm:$0xff] }
   0xe   :  { %189 = vmatpush.xpose.msk.msra.mxu0 %vm39_vm0, %v31_v6 }
   0xf   :  { %198 = vmatpush.xpose.msk.msra.mxu1 %vm100_vm1, %v92_v7 }
  0x12   :  { %190 = vmatpush.xpose.msk.msra.mxu0 %vm39_vm0, %v30_v8 }
  0x13   :  { %199 = vmatpush.xpose.msk.msra.mxu1 %vm100_vm1, %v91_v9 }
  0x16   :  { %191 = vmatpush.xpose.msk.msra.mxu0 %vm39_vm0, %v29_v10 }
  0x17   :  { %200 = vmatpush.xpose.msk.msra.mxu1 %vm100_vm1, %v90_v11 }
  0x1a   :  { %192 = vmatpush.xpose.msk.msra.mxu0 %vm39_vm0, %v28_v12 }
  0x1b   :  { %201 = vmatpush.xpose.msk.msra.mxu1 %vm100_vm1, %v89_v13 }
  0x1e   :  { %193 = vmatpush.xpose.msk.msra.mxu0 %vm39_vm0, %v27_v14 }
  0x1f   :  { %202 = vmatpush.xpose.msk.msra.mxu1 %vm100_vm1, %v88_v16 }
  0x21   :  { %194 = vmatmul.msk.f32.vlgmr.msra.gmra.mxu0 %vm39_vm0, %v26_v15 }
  0x9e   :  { %v84_v18 = vpop.f32.mrf.mxu0 }
  0x9f   :  { %v85_v19 = vadd.f32 %v206_v17, %v84_v18 }
  0xa1   :  { %v87_v20 = vmax.f32 %v85_v19, 0.0 }
  0xa3   :  { %203 = vmatmul.msk.f32.vlgmr.msra.gmra.mxu1 %vm100_vm1, %v87_v20 }
 0x120   :  { %v145_v23 = vpop.f32.mrf.mxu1 }
 0x121   :  { %v146_v24 = vadd.f32 %v207_v22, %v145_v23 }
 0x123   :  { %v148_v25 = vmax.f32 %v146_v24, 0.0 }
 0x125   :  { %205 = vmatmul.msk.f32.vlgmr.msra.gmra.mxu2 %vm100_vm1, %v148_v25 }
 0x1a8   :  { %v177_v27 = vpop.f32.mrf.mxu2 }
 0x1a9   :  { %v178_v28 = vadd.f32 %v208_v26, %v177_v27 }
 0x1ab   :  { %181 = vst.msk [vmem:[%s342_s7] sm:$0xff] %vm180_vm2, %v178_v28 }

</bundles_post_ra>
